<compile_context>
chip_gen: v7x
topology: tpu7x:2x2x1
jax: 0.10.0
libtpu: 0.0.40
codegen_flags: <defaults>
</compile_context>

<pallas_src>
import math

import jax
import jax.numpy as jnp
import numpy as np
from jax.experimental import pallas as pl
from jax.experimental.pallas import tpu as pltpu

HIDDEN = 256
LN_EPS = 1e-5                      # PyTorch nn.LayerNorm default
VMEM_LIMIT_BYTES = 32 * 1024 * 1024  # >= scoped default on every generation, safe on all
MIN_SPLIT_ROWS = 256               # split batch across cores only if each half gets >= this


def _round_up(x, m):
    return (x + m - 1) // m * m


# ---------------------------------------------------------------------------
# Pallas kernel: forward pass for one batch tile; weights stay VMEM-resident.
# ---------------------------------------------------------------------------
def policy_kernel(state_ref,
                  w1_ref, p1_ref,   # p1 = [b1; gamma1; beta1]            (3, 128)
                  w2_ref, p2_ref,   # p2 = [b2_even; b2_odd; g2; be2]     (4, 256)
                  w3_ref, p3_ref,   # p3 = [b3_even; b3_odd; g3; be3]     (4, 256)
                  w4_ref, p4_ref,   # p4 = mu bias, zero-padded           (1, mu_cols)
                  mu_ref):

    act_dtype = w2_ref.dtype  # bf16 fast path keeps inter-layer activations in bf16

    def layer_norm(x, g, b):
        # Subtracted-form variance (no cancellation); rsqrt goes to the EUP.
        m = jnp.mean(x, axis=-1, keepdims=True)
        d = x - m
        var = jnp.mean(d * d, axis=-1, keepdims=True)
        return d * jax.lax.rsqrt(var + LN_EPS) * g + b

    def linear_pool_ln_relu(h, w_ref, p_ref):
        # One (K, 512) matmul with even output columns stored first; the
        # MaxPool1d(2,2) becomes a max of the two lane-aligned 256-wide halves.
        z = jnp.dot(h, w_ref[...], preferred_element_type=jnp.float32)
        half = z.shape[-1] // 2
        pooled = jnp.maximum(z[:, :half] + p_ref[0:1, :],
                             z[:, half:] + p_ref[1:2, :])
        h_out = jnp.maximum(layer_norm(pooled, p_ref[2:3, :], p_ref[3:4, :]), 0.0)
        return h_out.astype(act_dtype)            # fused output cast (bf16 path)

    x = state_ref[...].astype(w1_ref.dtype)

    # l1 block 1: Linear(input_dim, 128) -> LayerNorm(128) -> ReLU
    h = jnp.dot(x, w1_ref[...], preferred_element_type=jnp.float32) + p1_ref[0:1, :]
    h = jnp.maximum(layer_norm(h, p1_ref[1:2, :], p1_ref[2:3, :]), 0.0).astype(act_dtype)

    # l1 block 2: Linear(128, 512) -> pair-max pool (512->256) -> LN(256) -> ReLU
    h = linear_pool_ln_relu(h, w2_ref, p2_ref)

    # l2: Linear(256, 512) -> MaxPool1d(2, 2) -> LayerNorm(256) -> ReLU
    h = linear_pool_ln_relu(h, w3_ref, p3_ref)

    # mu head (feature dim padded to a full lane tile; sliced back in the wrapper)
    mu_ref[...] = (jnp.dot(h, w4_ref[...], preferred_element_type=jnp.float32)
                   + p4_ref[...]).astype(mu_ref.dtype)


# ---------------------------------------------------------------------------
# One-time parameter repacking: torch layout -> kernel layout.
# ---------------------------------------------------------------------------
def prepare_params(p, matmul_dtype):
    """Merged / packed / padded kernel-layout params.  Call ONCE per model."""
    def even_first(w):
        # Even output columns first, then odd: MaxPool1d(2,2) == max of halves.
        return jnp.concatenate([w[:, 0::2], w[:, 1::2]], axis=1)

    A = p["w4"].shape[1]
    mu_cols = _round_up(max(A, 1), 128)
    w4p = jnp.zeros((p["w4"].shape[0], mu_cols), jnp.float32).at[:, :A].set(p["w4"])
    b4p = jnp.zeros((1, mu_cols), jnp.float32).at[0, :A].set(p["b4"])
    return dict(
        w1=p["w1"].astype(matmul_dtype),
        p1=jnp.stack([p["b1"], p["g1"], p["be1"]], axis=0),
        w2=even_first(p["w2"]).astype(matmul_dtype),
        p2=jnp.stack([p["b2"][0::2], p["b2"][1::2], p["g2"], p["be2"]], axis=0),
        w3=even_first(p["w3"]).astype(matmul_dtype),
        p3=jnp.stack([p["b3"][0::2], p["b3"][1::2], p["g3"], p["be3"]], axis=0),
        w4=w4p.astype(matmul_dtype),
        p4=b4p,
        mu_cols=mu_cols,
        action_size=A,
    )


# ---------------------------------------------------------------------------
# Capability probe: single-buffered resident operands (pl.Buffered(1)).
# ---------------------------------------------------------------------------
_SINGLE_BUFFER_OK = None


def _single_buffer_supported():
    """Probe once whether pipeline_mode=pl.Buffered(1) is accepted on this backend."""
    global _SINGLE_BUFFER_OK
    if _SINGLE_BUFFER_OK is not None:
        return _SINGLE_BUFFER_OK
    try:
        if not hasattr(pl, "Buffered"):
            raise AttributeError("pl.Buffered not available")

        def copy_kernel(x_ref, o_ref):
            o_ref[...] = x_ref[...]

        x = jnp.zeros((8, 128), jnp.float32)
        out = pl.pallas_call(
            copy_kernel,
            out_shape=jax.ShapeDtypeStruct((8, 128), jnp.float32),
            grid=(1,),
            in_specs=[pl.BlockSpec((8, 128), lambda i: (0, 0),
                                   pipeline_mode=pl.Buffered(1))],
            out_specs=pl.BlockSpec((8, 128), lambda i: (0, 0)),
        )(x)
        jax.block_until_ready(out)
        _SINGLE_BUFFER_OK = True
    except Exception:
        # Fall back to default double-buffering (identical results, ~1 MiB more VMEM).
        _SINGLE_BUFFER_OK = False
    return _SINGLE_BUFFER_OK


# ---------------------------------------------------------------------------
# Batch-tile selection: minimal padding + grid>=2 for megacore when worthwhile.
# ---------------------------------------------------------------------------
def _pick_block(batch, block_b):
    block_b = max(8, _round_up(block_b, 8))
    rows = _round_up(batch, 8)          # sublane alignment only (no big wrapper pad)
    if rows > block_b:
        bb = block_b
    elif rows >= 2 * MIN_SPLIT_ROWS:
        bb = _round_up((rows + 1) // 2, 8)   # grid >= 2: both v7x TensorCores get work
    else:
        bb = rows
    rows = _round_up(rows, bb)
    return bb, rows


def _build_forward(kp, in_dim, bb, rows, mu_dtype, single_buffer):
    resident_mode = pl.Buffered(1) if single_buffer else None

    def resident(shape):  # whole-array block + constant index_map -> DMA'd once
        if resident_mode is not None:
            return pl.BlockSpec(shape, lambda i: (0, 0), pipeline_mode=resident_mode)
        return pl.BlockSpec(shape, lambda i: (0, 0))

    mu_cols = kp["mu_cols"]
    return pl.pallas_call(
        policy_kernel,
        out_shape=jax.ShapeDtypeStruct((rows, mu_cols), mu_dtype),
        grid=(rows // bb,),
        in_specs=[
            pl.BlockSpec((bb, in_dim), lambda i: (i, 0)),    # state: tiled over rows
            resident(kp["w1"].shape), resident(kp["p1"].shape),
            resident(kp["w2"].shape), resident(kp["p2"].shape),
            resident(kp["w3"].shape), resident(kp["p3"].shape),
            resident(kp["w4"].shape), resident(kp["p4"].shape),
        ],
        out_specs=pl.BlockSpec((bb, mu_cols), lambda i: (i, 0)),
        compiler_params=pltpu.CompilerParams(
            dimension_semantics=("parallel",),
            vmem_limit_bytes=VMEM_LIMIT_BYTES),
    )


# ---------------------------------------------------------------------------
# Public API: prepare params once, return a forward(state) -> (mu, std) closure.
# ---------------------------------------------------------------------------
def make_net_policy_forward(params, *, block_b=1024, matmul_dtype=jnp.bfloat16,
                            mu_dtype=jnp.float32):
    kp = prepare_params(params, matmul_dtype)          # hoisted out of per-call path
    std = jnp.exp(params["log_std"])                    # state-independent, computed once
    A = kp["action_size"]
    single_buffer = _single_buffer_supported()

    # TODO(synk): for per-env-step inference (B <~ 64) the ~0.5 MiB of weights could be
    # kept VMEM-resident across calls via a cross-call DMA future (P10); at that size
    # the weight DMA + launch overhead dominates.  Not implemented here.
    def forward(state):
        B, in_dim = state.shape
        bb, rows = _pick_block(B, block_b)
        state_p = state if rows == B else jnp.pad(state, ((0, rows - B), (0, 0)))
        call = _build_forward(kp, in_dim, bb, rows, mu_dtype, single_buffer)
        mu_pad = call(state_p, kp["w1"], kp["p1"], kp["w2"], kp["p2"],
                      kp["w3"], kp["p3"], kp["w4"], kp["p4"])
        return mu_pad[:B, :A], std

    return forward


def net_policy_forward(state, params, **kwargs):
    """Convenience wrapper (re-packs params every call; prefer make_net_policy_forward)."""
    return make_net_policy_forward(params, **kwargs)(state)


# ---------------------------------------------------------------------------
# Deterministic parameter construction (matches module __init__ shapes/inits).
# ---------------------------------------------------------------------------
def init_params(key, obs_size, action_dim, n_agents, frame_stack=4, hidden=HIDDEN):
    input_dim = n_agents * obs_size * frame_stack
    action_size = action_dim * n_agents
    gain = math.sqrt(2.0)   # init.calculate_gain('relu')

    k1, k2, k3, k4 = jax.random.split(key, 4)
    orth = jax.nn.initializers.orthogonal
    return dict(
        w1=orth(scale=gain)(k1, (input_dim, hidden // 2), jnp.float32),
        b1=jnp.zeros((hidden // 2,), jnp.float32),
        g1=jnp.ones((hidden // 2,), jnp.float32),
        be1=jnp.zeros((hidden // 2,), jnp.float32),
        w2=orth(scale=gain)(k2, (hidden // 2, 2 * hidden), jnp.float32),
        b2=jnp.zeros((2 * hidden,), jnp.float32),
        g2=jnp.ones((hidden,), jnp.float32),
        be2=jnp.zeros((hidden,), jnp.float32),
        w3=orth(scale=gain)(k3, (hidden, 2 * hidden), jnp.float32),
        b3=jnp.zeros((2 * hidden,), jnp.float32),
        g3=jnp.ones((hidden,), jnp.float32),
        be3=jnp.zeros((hidden,), jnp.float32),
        w4=orth(scale=0.01)(k4, (hidden, action_size), jnp.float32),
        b4=jnp.zeros((action_size,), jnp.float32),
        log_std=jnp.zeros((action_size,), jnp.float32),
    )


# ---------------------------------------------------------------------------
# Pure-JAX reference in the ORIGINAL (torch) parameter layout, including the
# LayerNorm affine terms and a true MaxPool1d(2,2).
# ---------------------------------------------------------------------------
def reference_forward(state, p):
    def ln(x, g, b):
        m = jnp.mean(x, -1, keepdims=True)
        v = jnp.mean(jnp.square(x - m), -1, keepdims=True)
        return (x - m) / jnp.sqrt(v + LN_EPS) * g + b

    def maxpool2(x):   # MaxPool1d(kernel=2, stride=2) over the feature dim
        return jnp.max(x.reshape(x.shape[0], -1, 2), axis=-1)

    h = jax.nn.relu(ln(state @ p["w1"] + p["b1"], p["g1"], p["be1"]))
    h = jax.nn.relu(ln(maxpool2(h @ p["w2"] + p["b2"]), p["g2"], p["be2"]))
    h = jax.nn.relu(ln(maxpool2(h @ p["w3"] + p["b3"]), p["g3"], p["be3"]))
    mu = h @ p["w4"] + p["b4"]
    return mu, jnp.exp(p["log_std"])


if __name__ == "__main__":
    obs_size, action_dim, n_agents, frame_stack = 8, 3, 2, 4
    input_dim = n_agents * obs_size * frame_stack    # 64
    action_size = action_dim * n_agents              # 6

    key = jax.random.PRNGKey(0)
    pkey, xkey, xkey2 = jax.random.split(key, 3)
    params = init_params(pkey, obs_size, action_dim, n_agents, frame_stack)

    # Perturb biases / LN affine params so the check actually exercises those
    # terms (the default all-zeros/ones init would mask bugs in them).
    perturb = ["b1", "g1", "be1", "b2", "g2", "be2", "b3", "g3", "be3", "b4", "log_std"]
    for k, name in zip(jax.random.split(jax.random.PRNGKey(1), len(perturb)), perturb):
        params[name] = params[name] + 0.1 * jax.random.normal(k, params[name].shape,
                                                              jnp.float32)

    # --- small single-tile batch -------------------------------------------
    batch = 4
    state = jax.random.normal(xkey, (batch, input_dim), jnp.float32)
    mu_ref, std_ref = reference_forward(state, params)

    # Default fast path: bf16 weights + bf16 inter-layer activations, f32 accumulation.
    fwd_bf16 = make_net_policy_forward(params)            # matmul_dtype=bfloat16
    mu, std = fwd_bf16(state)
    jax.block_until_ready((mu, std))
    assert mu.shape == (batch, action_size)
    assert std.shape == (action_size,)
    np.testing.assert_allclose(np.asarray(mu), np.asarray(mu_ref), rtol=5e-2, atol=5e-2)
    np.testing.assert_allclose(np.asarray(std), np.asarray(std_ref), rtol=1e-6, atol=1e-6)

    # f32 debug/accuracy path (default MXU precision; moderate tolerance).
    fwd_f32 = make_net_policy_forward(params, matmul_dtype=jnp.float32)
    mu32, _ = fwd_f32(state)
    jax.block_until_ready(mu32)
    np.testing.assert_allclose(np.asarray(mu32), np.asarray(mu_ref), rtol=1e-2, atol=2e-3)

    # --- multi-tile / ragged batch: exercises the grid>=2 (megacore) split and
    # the minimal multiple-of-8 padding path --------------------------------
    batch2 = 520
    state2 = jax.random.normal(xkey2, (batch2, input_dim), jnp.float32)
    mu2_ref, _ = reference_forward(state2, params)
    mu2, _ = fwd_bf16(state2)
    jax.block_until_ready(mu2)
    assert mu2.shape == (batch2, action_size)
    np.testing.assert_allclose(np.asarray(mu2), np.asarray(mu2_ref), rtol=5e-2, atol=5e-2)

    print("KERNEL_OK")
</pallas_src>

<mosaic_0001>
module attributes {stable_mosaic.version = 11 : i64} {
  func.func @copy_kernel(%arg0: i32, %arg1: memref<8x128xf32, #tpu.memory_space<vmem>>, %arg2: memref<8x128xf32, #tpu.memory_space<vmem>>) attributes {dimension_semantics = [#tpu.dimension_semantics<arbitrary>], iteration_bounds = array<i64: 1>, scalar_prefetch = 0 : i64, scratch_operands = 0 : i64, tpu.core_type = #tpu.core_type<tc>, window_params = [{pipeline_mode = #tpu.pipeline_mode<synchronous>, transform_indices = @transform_0, window_bounds = array<i64: 8, 128>}, {pipeline_mode = #tpu.pipeline_mode<synchronous>, transform_indices = @transform_1, window_bounds = array<i64: 8, 128>}]} {
    %c0 = arith.constant 0 : index
    %c0_0 = arith.constant 0 : index
    %0 = vector.load %arg1[%c0, %c0_0] : memref<8x128xf32, #tpu.memory_space<vmem>>, vector<8x128xf32>
    %c0_1 = arith.constant 0 : index
    %c0_2 = arith.constant 0 : index
    %1 = vector.load %arg2[%c0_1, %c0_2] : memref<8x128xf32, #tpu.memory_space<vmem>>, vector<8x128xf32>
    tpu.vector_store %arg2[%c0_1, %c0_2], %0 {strides = array<i32>} : memref<8x128xf32, #tpu.memory_space<vmem>>, vector<8x128xf32>,
    return
  }
  func.func @transform_0(%arg0: i32) -> (i32, i32) {
    %c0_i32 = arith.constant 0 : i32
    %c0_i32_0 = arith.constant 0 : i32
    %c0_i32_1 = arith.constant 0 : i32
    return %c0_i32, %c0_i32_0 : i32, i32
  }
  func.func @transform_1(%arg0: i32) -> (i32, i32) {
    %c0_i32 = arith.constant 0 : i32
    %c0_i32_0 = arith.constant 0 : i32
    %c0_i32_1 = arith.constant 0 : i32
    return %c0_i32, %c0_i32_0 : i32, i32
  }
}

module attributes {stable_mosaic.version = 11 : i64} {
  func.func @policy_kernel(%arg0: i32, %arg1: memref<8x64xf32, #tpu.memory_space<vmem>>, %arg2: memref<64x128xbf16, #tpu.memory_space<vmem>>, %arg3: memref<3x128xf32, #tpu.memory_space<vmem>>, %arg4: memref<128x512xbf16, #tpu.memory_space<vmem>>, %arg5: memref<4x256xf32, #tpu.memory_space<vmem>>, %arg6: memref<256x512xbf16, #tpu.memory_space<vmem>>, %arg7: memref<4x256xf32, #tpu.memory_space<vmem>>, %arg8: memref<256x128xbf16, #tpu.memory_space<vmem>>, %arg9: memref<1x128xf32, #tpu.memory_space<vmem>>, %arg10: memref<8x128xf32, #tpu.memory_space<vmem>>) attributes {dimension_semantics = [#tpu.dimension_semantics<parallel>], iteration_bounds = array<i64: 1>, scalar_prefetch = 0 : i64, scratch_operands = 0 : i64, tpu.core_type = #tpu.core_type<tc>, window_params = [{transform_indices = @transform_0, window_bounds = array<i64: 8, 64>}, {pipeline_mode = #tpu.pipeline_mode<synchronous>, transform_indices = @transform_1, window_bounds = array<i64: 64, 128>}, {pipeline_mode = #tpu.pipeline_mode<synchronous>, transform_indices = @transform_2, window_bounds = array<i64: 3, 128>}, {pipeline_mode = #tpu.pipeline_mode<synchronous>, transform_indices = @transform_3, window_bounds = array<i64: 128, 512>}, {pipeline_mode = #tpu.pipeline_mode<synchronous>, transform_indices = @transform_4, window_bounds = array<i64: 4, 256>}, {pipeline_mode = #tpu.pipeline_mode<synchronous>, transform_indices = @transform_5, window_bounds = array<i64: 256, 512>}, {pipeline_mode = #tpu.pipeline_mode<synchronous>, transform_indices = @transform_6, window_bounds = array<i64: 4, 256>}, {pipeline_mode = #tpu.pipeline_mode<synchronous>, transform_indices = @transform_7, window_bounds = array<i64: 256, 128>}, {pipeline_mode = #tpu.pipeline_mode<synchronous>, transform_indices = @transform_8, window_bounds = array<i64: 1, 128>}, {transform_indices = @transform_9, window_bounds = array<i64: 8, 128>}]} {
    %c0 = arith.constant 0 : index
    %c0_0 = arith.constant 0 : index
    %0 = vector.load %arg1[%c0, %c0_0] : memref<8x64xf32, #tpu.memory_space<vmem>>, vector<8x64xf32>
    %1 = arith.truncf %0 : vector<8x64xf32> to vector<8x64xbf16>
    %c0_1 = arith.constant 0 : index
    %c0_2 = arith.constant 0 : index
    %2 = vector.load %arg2[%c0_1, %c0_2] : memref<64x128xbf16, #tpu.memory_space<vmem>>, vector<64x128xbf16>
    %cst = arith.constant dense<0.000000e+00> : vector<8x128xf32>
    %3 = tpu.matmul %1, %2, %cst {dimension_numbers = #tpu.dot_dimension_numbers<[1], [0], [0], [1], [0, 0, 1, 1], [], []>} : vector<8x64xbf16>, vector<64x128xbf16>, vector<8x128xf32> -> vector<8x128xf32>
    %c0_3 = arith.constant 0 : index
    %c0_4 = arith.constant 0 : index
    %4 = vector.load %arg3[%c0_3, %c0_4] : memref<3x128xf32, #tpu.memory_space<vmem>>, vector<1x128xf32>
    %5 = vector.broadcast %4 : vector<1x128xf32> to vector<8x128xf32>
    %6 = arith.addf %3, %5 : vector<8x128xf32>
    %c1 = arith.constant 1 : index
    %c0_5 = arith.constant 0 : index
    %7 = vector.load %arg3[%c1, %c0_5] : memref<3x128xf32, #tpu.memory_space<vmem>>, vector<1x128xf32>
    %c2 = arith.constant 2 : index
    %c0_6 = arith.constant 0 : index
    %8 = vector.load %arg3[%c2, %c0_6] : memref<3x128xf32, #tpu.memory_space<vmem>>, vector<1x128xf32>
    %cst_7 = arith.constant dense<0.000000e+00> : vector<8xf32>
    %9 = vector.multi_reduction <add>, %6, %cst_7 [1] : vector<8x128xf32> to vector<8xf32>
    %10 = vector.shape_cast %9 : vector<8xf32> to vector<8x1xf32>
    %cst_8 = arith.constant 1.280000e+02 : f32
    %11 = vector.broadcast %cst_8 : f32 to vector<8x1xf32>
    %12 = arith.divf %10, %11 : vector<8x1xf32>
    %13 = vector.broadcast %12 : vector<8x1xf32> to vector<8x128xf32>
    %14 = arith.subf %6, %13 : vector<8x128xf32>
    %15 = arith.mulf %14, %14 : vector<8x128xf32>
    %cst_9 = arith.constant dense<0.000000e+00> : vector<8xf32>
    %16 = vector.multi_reduction <add>, %15, %cst_9 [1] : vector<8x128xf32> to vector<8xf32>
    %17 = vector.shape_cast %16 : vector<8xf32> to vector<8x1xf32>
    %cst_10 = arith.constant 1.280000e+02 : f32
    %18 = vector.broadcast %cst_10 : f32 to vector<8x1xf32>
    %19 = arith.divf %17, %18 : vector<8x1xf32>
    %cst_11 = arith.constant 9.99999974E-6 : f32
    %20 = vector.broadcast %cst_11 : f32 to vector<8x1xf32>
    %21 = arith.addf %19, %20 : vector<8x1xf32>
    %22 = math.rsqrt %21 : vector<8x1xf32>
    %23 = vector.broadcast %22 : vector<8x1xf32> to vector<8x128xf32>
    %24 = arith.mulf %14, %23 : vector<8x128xf32>
    %25 = vector.broadcast %7 : vector<1x128xf32> to vector<8x128xf32>
    %26 = arith.mulf %24, %25 : vector<8x128xf32>
    %27 = vector.broadcast %8 : vector<1x128xf32> to vector<8x128xf32>
    %28 = arith.addf %26, %27 : vector<8x128xf32>
    %cst_12 = arith.constant 0.000000e+00 : f32
    %29 = vector.broadcast %cst_12 : f32 to vector<8x128xf32>
    %30 = arith.maximumf %28, %29 : vector<8x128xf32>
    %31 = arith.truncf %30 : vector<8x128xf32> to vector<8x128xbf16>
    %c0_13 = arith.constant 0 : index
    %c0_14 = arith.constant 0 : index
    %32 = vector.load %arg4[%c0_13, %c0_14] : memref<128x512xbf16, #tpu.memory_space<vmem>>, vector<128x512xbf16>
    %cst_15 = arith.constant dense<0.000000e+00> : vector<8x512xf32>
    %33 = tpu.matmul %31, %32, %cst_15 {dimension_numbers = #tpu.dot_dimension_numbers<[1], [0], [0], [1], [0, 0, 1, 1], [], []>} : vector<8x128xbf16>, vector<128x512xbf16>, vector<8x512xf32> -> vector<8x512xf32>
    %34 = vector.extract_strided_slice %33 {offsets = [0, 0], sizes = [8, 256], strides = [1, 1]} : vector<8x512xf32> to vector<8x256xf32>
    %c0_16 = arith.constant 0 : index
    %c0_17 = arith.constant 0 : index
    %35 = vector.load %arg5[%c0_16, %c0_17] : memref<4x256xf32, #tpu.memory_space<vmem>>, vector<1x256xf32>
    %36 = vector.broadcast %35 : vector<1x256xf32> to vector<8x256xf32>
    %37 = arith.addf %34, %36 : vector<8x256xf32>
    %38 = vector.extract_strided_slice %33 {offsets = [0, 256], sizes = [8, 256], strides = [1, 1]} : vector<8x512xf32> to vector<8x256xf32>
    %c1_18 = arith.constant 1 : index
    %c0_19 = arith.constant 0 : index
    %39 = vector.load %arg5[%c1_18, %c0_19] : memref<4x256xf32, #tpu.memory_space<vmem>>, vector<1x256xf32>
    %40 = vector.broadcast %39 : vector<1x256xf32> to vector<8x256xf32>
    %41 = arith.addf %38, %40 : vector<8x256xf32>
    %42 = arith.maximumf %37, %41 : vector<8x256xf32>
    %c2_20 = arith.constant 2 : index
    %c0_21 = arith.constant 0 : index
    %43 = vector.load %arg5[%c2_20, %c0_21] : memref<4x256xf32, #tpu.memory_space<vmem>>, vector<1x256xf32>
    %c3 = arith.constant 3 : index
    %c0_22 = arith.constant 0 : index
    %44 = vector.load %arg5[%c3, %c0_22] : memref<4x256xf32, #tpu.memory_space<vmem>>, vector<1x256xf32>
    %cst_23 = arith.constant dense<0.000000e+00> : vector<8xf32>
    %45 = vector.multi_reduction <add>, %42, %cst_23 [1] : vector<8x256xf32> to vector<8xf32>
    %46 = vector.shape_cast %45 : vector<8xf32> to vector<8x1xf32>
    %cst_24 = arith.constant 2.560000e+02 : f32
    %47 = vector.broadcast %cst_24 : f32 to vector<8x1xf32>
    %48 = arith.divf %46, %47 : vector<8x1xf32>
    %49 = vector.broadcast %48 : vector<8x1xf32> to vector<8x256xf32>
    %50 = arith.subf %42, %49 : vector<8x256xf32>
    %51 = arith.mulf %50, %50 : vector<8x256xf32>
    %cst_25 = arith.constant dense<0.000000e+00> : vector<8xf32>
    %52 = vector.multi_reduction <add>, %51, %cst_25 [1] : vector<8x256xf32> to vector<8xf32>
    %53 = vector.shape_cast %52 : vector<8xf32> to vector<8x1xf32>
    %cst_26 = arith.constant 2.560000e+02 : f32
    %54 = vector.broadcast %cst_26 : f32 to vector<8x1xf32>
    %55 = arith.divf %53, %54 : vector<8x1xf32>
    %cst_27 = arith.constant 9.99999974E-6 : f32
    %56 = vector.broadcast %cst_27 : f32 to vector<8x1xf32>
    %57 = arith.addf %55, %56 : vector<8x1xf32>
    %58 = math.rsqrt %57 : vector<8x1xf32>
    %59 = vector.broadcast %58 : vector<8x1xf32> to vector<8x256xf32>
    %60 = arith.mulf %50, %59 : vector<8x256xf32>
    %61 = vector.broadcast %43 : vector<1x256xf32> to vector<8x256xf32>
    %62 = arith.mulf %60, %61 : vector<8x256xf32>
    %63 = vector.broadcast %44 : vector<1x256xf32> to vector<8x256xf32>
    %64 = arith.addf %62, %63 : vector<8x256xf32>
    %cst_28 = arith.constant 0.000000e+00 : f32
    %65 = vector.broadcast %cst_28 : f32 to vector<8x256xf32>
    %66 = arith.maximumf %64, %65 : vector<8x256xf32>
    %67 = arith.truncf %66 : vector<8x256xf32> to vector<8x256xbf16>
    %c0_29 = arith.constant 0 : index
    %c0_30 = arith.constant 0 : index
    %68 = vector.load %arg6[%c0_29, %c0_30] : memref<256x512xbf16, #tpu.memory_space<vmem>>, vector<256x512xbf16>
    %cst_31 = arith.constant dense<0.000000e+00> : vector<8x512xf32>
    %69 = tpu.matmul %67, %68, %cst_31 {dimension_numbers = #tpu.dot_dimension_numbers<[1], [0], [0], [1], [0, 0, 1, 1], [], []>} : vector<8x256xbf16>, vector<256x512xbf16>, vector<8x512xf32> -> vector<8x512xf32>
    %70 = vector.extract_strided_slice %69 {offsets = [0, 0], sizes = [8, 256], strides = [1, 1]} : vector<8x512xf32> to vector<8x256xf32>
    %c0_32 = arith.constant 0 : index
    %c0_33 = arith.constant 0 : index
    %71 = vector.load %arg7[%c0_32, %c0_33] : memref<4x256xf32, #tpu.memory_space<vmem>>, vector<1x256xf32>
    %72 = vector.broadcast %71 : vector<1x256xf32> to vector<8x256xf32>
    %73 = arith.addf %70, %72 : vector<8x256xf32>
    %74 = vector.extract_strided_slice %69 {offsets = [0, 256], sizes = [8, 256], strides = [1, 1]} : vector<8x512xf32> to vector<8x256xf32>
    %c1_34 = arith.constant 1 : index
    %c0_35 = arith.constant 0 : index
    %75 = vector.load %arg7[%c1_34, %c0_35] : memref<4x256xf32, #tpu.memory_space<vmem>>, vector<1x256xf32>
    %76 = vector.broadcast %75 : vector<1x256xf32> to vector<8x256xf32>
    %77 = arith.addf %74, %76 : vector<8x256xf32>
    %78 = arith.maximumf %73, %77 : vector<8x256xf32>
    %c2_36 = arith.constant 2 : index
    %c0_37 = arith.constant 0 : index
    %79 = vector.load %arg7[%c2_36, %c0_37] : memref<4x256xf32, #tpu.memory_space<vmem>>, vector<1x256xf32>
    %c3_38 = arith.constant 3 : index
    %c0_39 = arith.constant 0 : index
    %80 = vector.load %arg7[%c3_38, %c0_39] : memref<4x256xf32, #tpu.memory_space<vmem>>, vector<1x256xf32>
    %cst_40 = arith.constant dense<0.000000e+00> : vector<8xf32>
    %81 = vector.multi_reduction <add>, %78, %cst_40 [1] : vector<8x256xf32> to vector<8xf32>
    %82 = vector.shape_cast %81 : vector<8xf32> to vector<8x1xf32>
    %cst_41 = arith.constant 2.560000e+02 : f32
    %83 = vector.broadcast %cst_41 : f32 to vector<8x1xf32>
    %84 = arith.divf %82, %83 : vector<8x1xf32>
    %85 = vector.broadcast %84 : vector<8x1xf32> to vector<8x256xf32>
    %86 = arith.subf %78, %85 : vector<8x256xf32>
    %87 = arith.mulf %86, %86 : vector<8x256xf32>
    %cst_42 = arith.constant dense<0.000000e+00> : vector<8xf32>
    %88 = vector.multi_reduction <add>, %87, %cst_42 [1] : vector<8x256xf32> to vector<8xf32>
    %89 = vector.shape_cast %88 : vector<8xf32> to vector<8x1xf32>
    %cst_43 = arith.constant 2.560000e+02 : f32
    %90 = vector.broadcast %cst_43 : f32 to vector<8x1xf32>
    %91 = arith.divf %89, %90 : vector<8x1xf32>
    %cst_44 = arith.constant 9.99999974E-6 : f32
    %92 = vector.broadcast %cst_44 : f32 to vector<8x1xf32>
    %93 = arith.addf %91, %92 : vector<8x1xf32>
    %94 = math.rsqrt %93 : vector<8x1xf32>
    %95 = vector.broadcast %94 : vector<8x1xf32> to vector<8x256xf32>
    %96 = arith.mulf %86, %95 : vector<8x256xf32>
    %97 = vector.broadcast %79 : vector<1x256xf32> to vector<8x256xf32>
    %98 = arith.mulf %96, %97 : vector<8x256xf32>
    %99 = vector.broadcast %80 : vector<1x256xf32> to vector<8x256xf32>
    %100 = arith.addf %98, %99 : vector<8x256xf32>
    %cst_45 = arith.constant 0.000000e+00 : f32
    %101 = vector.broadcast %cst_45 : f32 to vector<8x256xf32>
    %102 = arith.maximumf %100, %101 : vector<8x256xf32>
    %103 = arith.truncf %102 : vector<8x256xf32> to vector<8x256xbf16>
    %c0_46 = arith.constant 0 : index
    %c0_47 = arith.constant 0 : index
    %104 = vector.load %arg8[%c0_46, %c0_47] : memref<256x128xbf16, #tpu.memory_space<vmem>>, vector<256x128xbf16>
    %cst_48 = arith.constant dense<0.000000e+00> : vector<8x128xf32>
    %105 = tpu.matmul %103, %104, %cst_48 {dimension_numbers = #tpu.dot_dimension_numbers<[1], [0], [0], [1], [0, 0, 1, 1], [], []>} : vector<8x256xbf16>, vector<256x128xbf16>, vector<8x128xf32> -> vector<8x128xf32>
    %c0_49 = arith.constant 0 : index
    %c0_50 = arith.constant 0 : index
    %106 = vector.load %arg9[%c0_49, %c0_50] : memref<1x128xf32, #tpu.memory_space<vmem>>, vector<1x128xf32>
    %107 = vector.broadcast %106 : vector<1x128xf32> to vector<8x128xf32>
    %108 = arith.addf %105, %107 : vector<8x128xf32>
    %c0_51 = arith.constant 0 : index
    %c0_52 = arith.constant 0 : index
    %109 = vector.load %arg10[%c0_51, %c0_52] : memref<8x128xf32, #tpu.memory_space<vmem>>, vector<8x128xf32>
    tpu.vector_store %arg10[%c0_51, %c0_52], %108 {strides = array<i32>} : memref<8x128xf32, #tpu.memory_space<vmem>>, vector<8x128xf32>,
    return
  }
  func.func @transform_0(%arg0: i32) -> (i32, i32) {
    %c0_i32 = arith.constant 0 : i32
    %c0_i32_0 = arith.constant 0 : i32
    return %arg0, %c0_i32 : i32, i32
  }
  func.func @transform_1(%arg0: i32) -> (i32, i32) {
    %c0_i32 = arith.constant 0 : i32
    %c0_i32_0 = arith.constant 0 : i32
    %c0_i32_1 = arith.constant 0 : i32
    return %c0_i32, %c0_i32_0 : i32, i32
  }
  func.func @transform_2(%arg0: i32) -> (i32, i32) {
    %c0_i32 = arith.constant 0 : i32
    %c0_i32_0 = arith.constant 0 : i32
    %c0_i32_1 = arith.constant 0 : i32
    return %c0_i32, %c0_i32_0 : i32, i32
  }
  func.func @transform_3(%arg0: i32) -> (i32, i32) {
    %c0_i32 = arith.constant 0 : i32
    %c0_i32_0 = arith.constant 0 : i32
    %c0_i32_1 = arith.constant 0 : i32
    return %c0_i32, %c0_i32_0 : i32, i32
  }
  func.func @transform_4(%arg0: i32) -> (i32, i32) {
    %c0_i32 = arith.constant 0 : i32
    %c0_i32_0 = arith.constant 0 : i32
    %c0_i32_1 = arith.constant 0 : i32
    return %c0_i32, %c0_i32_0 : i32, i32
  }
  func.func @transform_5(%arg0: i32) -> (i32, i32) {
    %c0_i32 = arith.constant 0 : i32
    %c0_i32_0 = arith.constant 0 : i32
    %c0_i32_1 = arith.constant 0 : i32
    return %c0_i32, %c0_i32_0 : i32, i32
  }
  func.func @transform_6(%arg0: i32) -> (i32, i32) {
    %c0_i32 = arith.constant 0 : i32
    %c0_i32_0 = arith.constant 0 : i32
    %c0_i32_1 = arith.constant 0 : i32
    return %c0_i32, %c0_i32_0 : i32, i32
  }
  func.func @transform_7(%arg0: i32) -> (i32, i32) {
    %c0_i32 = arith.constant 0 : i32
    %c0_i32_0 = arith.constant 0 : i32
    %c0_i32_1 = arith.constant 0 : i32
    return %c0_i32, %c0_i32_0 : i32, i32
  }
  func.func @transform_8(%arg0: i32) -> (i32, i32) {
    %c0_i32 = arith.constant 0 : i32
    %c0_i32_0 = arith.constant 0 : i32
    %c0_i32_1 = arith.constant 0 : i32
    return %c0_i32, %c0_i32_0 : i32, i32
  }
  func.func @transform_9(%arg0: i32) -> (i32, i32) {
    %c0_i32 = arith.constant 0 : i32
    %c0_i32_0 = arith.constant 0 : i32
    return %arg0, %c0_i32 : i32, i32
  }
}

</mosaic_0001>

<bundles_post_ra>
// kernel: tpu_custom_call.1
= control target key start
LH: loop header
LB: loop body
LE: loop exit
PB: predicated region body
PF: predicated region fallthrough
CT: control target
= control target key end

     0   :  { %6 = vsyncpa [#allocation3], 0  ;;  %s124_s0 = inlined_call_operand.hbm [shape: f32[8,128], index: 0, kind: input, shape index: {}]   ;;  %s125_s1 = inlined_call_operand.hbm [shape: f32[8,128], index: 1, kind: output, shape index: {}]  }
   0x1   :  { %7 = vsyncpa [#allocation4], 0  ;;  %s88_s6 = smov [#allocation2]   ;;  %s40_s10 = scalar_lea.hbm %s124_s0, 128 }
   0x2   :  { %s14_s7 = sshll.u32 %s88_s6, 4  ;;  %p41_p0 = scmp.ne.s32.totalorder %s124_s0, %s40_s10  ;;  %s15_s7 = int_to_ptr.vmem [resolvable:$true] %s14_s7 }
   0x3   :  { %p44_p1 = scmp.lt.u32.totalorder %s40_s10, %s124_s0 }
   0x5   :  { %p46_p2 = pnand %p44_p1, %p41_p0 }
   0x7   :  { %49 = shalt.err (!%p46_p2)
}
   0x8   :  { %s50_s15 = scalar_lea.vmem %s15_s7, 128  ;;  %p55_p4 = scmp.lt.s32.totalorder %s15_s7, %s15_s7 }
   0x9   :  { %p51_p3 = scmp.ne.s32.totalorder %s15_s7, %s50_s15  ;;  %p56_p5 = scmp.lt.s32.totalorder %s50_s15, %s50_s15 }
   0xb   :  { %p57_p6 = por %p56_p5, %p55_p4 }
   0xd   :  { %p58_p7 = pnand %p57_p6, %p51_p3 }
   0xf   :  { %61 = shalt.err (!%p58_p7)
}
  0x10   :  { %17 = dma.hbm_to_vmem [thread:$0]  %s124_s0, 128, %s15_s7, [#allocation3]  }
  0x11   :  { %84 = dma.done.wait [#allocation3], 128  }
  0x12   :  { %85 = vsyncadd [#allocation3], 4294967168  ;;  %s89_s18 = smov [#allocation5]   ;;  %v21_v0 = vld [vmem:[#allocation2] sm:$0xff] }
  0x13   :  { %s29_s19 = sshll.u32 %s89_s18, 4  ;;  %22 = vst [vmem:[#allocation5] sm:$0xff] %v21_v0  ;;  %s30_s19 = int_to_ptr.vmem [resolvable:$true] %s29_s19 }
  0x14   :  { %s62_s20 = scalar_lea.vmem %s30_s19, 128  ;;  %p67_p9 = scmp.lt.s32.totalorder %s30_s19, %s30_s19 }
  0x15   :  { %p63_p8 = scmp.ne.s32.totalorder %s30_s19, %s62_s20  ;;  %p68_p10 = scmp.lt.s32.totalorder %s62_s20, %s62_s20 }
  0x17   :  { %p69_p11 = por %p68_p10, %p67_p9 }
  0x19   :  { %p70_p12 = pnand %p69_p11, %p63_p8 }
  0x1b   :  { %73 = shalt.err (!%p70_p12)
}
  0x1c   :  { %s74_s23 = scalar_lea.hbm %s125_s1, 128 }
  0x1d   :  { %p75_p13 = scmp.ne.s32.totalorder %s125_s1, %s74_s23  ;;  %p78_p0 = scmp.lt.u32.totalorder %s74_s23, %s125_s1 }
  0x1f   :  { %p80_p1 = pnand %p78_p0, %p75_p13 }
  0x21   :  { %83 = shalt.err (!%p80_p1)
}
  0x22   :  { %32 = dma.vmem_to_hbm [thread:$0]  %s30_s19, 128, %s125_s1, [#allocation4]  }
  0x23   :  { %86 = dma.done.wait [#allocation4], 128  }
  0x24   :  { %87 = vsyncadd [#allocation4], 4294967168 }
  0x25   :  { %36 = vsyncpa [#allocation3], 1 }
  0x26   :  { %37 = vsyncpa [#allocation4], 1 }

// kernel: tpu_custom_call.1
= control target key start
LH: loop header
LB: loop body
LE: loop exit
PB: predicated region body
PF: predicated region fallthrough
CT: control target
= control target key end

     0   :  { %14 = vsyncpa [#allocation3], 0  ;;  %s2059_s0 = inlined_call_operand.hbm [shape: f32[8,64], index: 0, kind: input, shape index: {}]   ;;  %s2060_s1 = inlined_call_operand.hbm [shape: bf16[64,128], index: 1, kind: input, shape index: {}]   ;;  %s2061_s2 = inlined_call_operand.hbm [shape: f32[3,128], index: 2, kind: input, shape index: {}]   ;;  %s2062_s3 = inlined_call_operand.hbm [shape: bf16[128,512], index: 3, kind: input, shape index: {}]   ;;  %s2063_s4 = inlined_call_operand.vmem [shape: f32[4,256], index: 4, kind: input, shape index: {}]   ;;  %s2064_s5 = inlined_call_operand.hbm [shape: bf16[256,512], index: 5, kind: input, shape index: {}]   ;;  %s2065_s6 = inlined_call_operand.vmem [shape: f32[4,256], index: 6, kind: input, shape index: {}]   ;;  %s2066_s7 = inlined_call_operand.hbm [shape: bf16[256,128], index: 7, kind: input, shape index: {}]   ;;  %s2067_s8 = inlined_call_operand.vmem [shape: f32[1,128], index: 8, kind: input, shape index: {}]   ;;  %s2068_s9 = inlined_call_operand.hbm [shape: f32[8,128], index: 9, kind: output, shape index: {}]  }
   0x1   :  { %15 = vsyncpa [#allocation6], 0 }
   0x2   :  { %16 = vsyncpa [#allocation9], 0 }
   0x3   :  { %17 = vsyncpa [#allocation12], 0 }
   0x4   :  { %18 = vsyncpa [#allocation4], 0  ;;  %s1832_s30 = smov [#allocation5]   ;;  %s1668_s13 = scalar_lea.hbm %s2060_s1, 512 }
   0x5   :  { %s34_s10 = sshll.u32 %s1832_s30, 4  ;;  %p1669_p0 = scmp.ne.s32.totalorder %s2060_s1, %s1668_s13  ;;  %s35_s10 = int_to_ptr.vmem [resolvable:$true] %s34_s10 }
   0x6   :  { %p1672_p1 = scmp.lt.u32.totalorder %s1668_s13, %s2060_s1 }
   0x8   :  { %p1674_p2 = pnand %p1672_p1, %p1669_p0 }
   0xa   :  { %1677 = shalt.err (!%p1674_p2)
}
   0xb   :  { %s1678_s18 = scalar_lea.vmem %s35_s10, 512  ;;  %p1683_p4 = scmp.lt.s32.totalorder %s35_s10, %s35_s10 }
   0xc   :  { %p1679_p3 = scmp.ne.s32.totalorder %s35_s10, %s1678_s18  ;;  %p1684_p5 = scmp.lt.s32.totalorder %s1678_s18, %s1678_s18 }
   0xe   :  { %p1685_p6 = por %p1684_p5, %p1683_p4 }
  0x10   :  { %p1686_p7 = pnand %p1685_p6, %p1679_p3 }
  0x12   :  { %1689 = shalt.err (!%p1686_p7)
}
  0x13   :  { %s1833_s19 = smov 64   ;;  %s1834_s20 = smov 4  }
  0x14   :  { %40 = dma.hbm_to_vmem [thread:$0]  %s2060_s1, 512, %s35_s10, [#allocation6], %s1833_s19, %s1833_s19, %s1834_s20  }
  0x15   :  { %s1835_s23 = smov [#allocation8]   ;;  %s1690_s27 = scalar_lea.hbm %s2062_s3, 4096 }
  0x16   :  { %s56_s24 = sshll.u32 %s1835_s23, 4  ;;  %p1691_p8 = scmp.ne.s32.totalorder %s2062_s3, %s1690_s27  ;;  %s57_s24 = int_to_ptr.vmem [resolvable:$true] %s56_s24 }
  0x17   :  { %p1694_p9 = scmp.lt.u32.totalorder %s1690_s27, %s2062_s3 }
  0x19   :  { %p1696_p10 = pnand %p1694_p9, %p1691_p8 }
  0x1b   :  { %1699 = shalt.err (!%p1696_p10)
}
  0x1c   :  { %s1700_s12 = scalar_lea.vmem %s57_s24, 4096  ;;  %p1705_p12 = scmp.lt.s32.totalorder %s57_s24, %s57_s24 }
  0x1d   :  { %p1701_p11 = scmp.ne.s32.totalorder %s57_s24, %s1700_s12  ;;  %p1706_p13 = scmp.lt.s32.totalorder %s1700_s12, %s1700_s12 }
  0x1f   :  { %p1707_p0 = por %p1706_p13, %p1705_p12 }
  0x21   :  { %p1708_p1 = pnand %p1707_p0, %p1701_p11 }
  0x23   :  { %1711 = shalt.err (!%p1708_p1)
}
  0x24   :  { %s1836_s1 = smov 256   ;;  %s1837_s10 = smov 16  }
  0x25   :  { %62 = dma.hbm_to_vmem [thread:$0]  %s2062_s3, 4096, %s57_s24, [#allocation9], %s1836_s1, %s1836_s1, %s1837_s10  }
  0x26   :  { %s1838_s15 = smov [#allocation2]   ;;  %s1839_s17 = smov [#allocation7]  }
  0x27   :  { %s25_s16 = sshll.u32 %s1838_s15, 4  ;;  %s47_s18 = sshll.u32 %s1839_s17, 4  ;;  %s26_s16 = int_to_ptr.vmem [resolvable:$true] %s25_s16  ;;  %s48_s18 = int_to_ptr.vmem [resolvable:$true] %s47_s18 }
  0x28   :  { %s1712_s23 = scalar_lea.hbm %s2059_s0, 128 }
  0x29   :  { %p1713_p2 = scmp.ne.s32.totalorder %s2059_s0, %s1712_s23  ;;  %p1716_p3 = scmp.lt.u32.totalorder %s1712_s23, %s2059_s0 }
  0x2b   :  { %p1718_p4 = pnand %p1716_p3, %p1713_p2 }
  0x2d   :  { %1721 = shalt.err (!%p1718_p4)
}
  0x2e   :  { %s1722_s3 = scalar_lea.vmem %s26_s16, 128  ;;  %p1727_p6 = scmp.lt.s32.totalorder %s26_s16, %s26_s16 }
  0x2f   :  { %p1723_p5 = scmp.ne.s32.totalorder %s26_s16, %s1722_s3  ;;  %p1728_p7 = scmp.lt.s32.totalorder %s1722_s3, %s1722_s3 }
  0x31   :  { %p1729_p8 = por %p1728_p7, %p1727_p6 }
  0x33   :  { %p1730_p9 = pnand %p1729_p8, %p1723_p5 }
  0x35   :  { %1733 = shalt.err (!%p1730_p9)
}
  0x36   :  { %28 = dma.hbm_to_vmem [thread:$0]  %s2059_s0, 128, %s26_s16, [#allocation3]  }
  0x37   :  { %s1734_s12 = scalar_lea.hbm %s2061_s2, 64 }
  0x38   :  { %p1735_p10 = scmp.ne.s32.totalorder %s2061_s2, %s1734_s12  ;;  %p1738_p11 = scmp.lt.u32.totalorder %s1734_s12, %s2061_s2 }
  0x3a   :  { %p1740_p12 = pnand %p1738_p11, %p1735_p10 }
  0x3c   :  { %1743 = shalt.err (!%p1740_p12)
}
  0x3d   :  { %s1744_s21 = scalar_lea.vmem %s48_s18, 64  ;;  %p1749_p0 = scmp.lt.s32.totalorder %s48_s18, %s48_s18 }
  0x3e   :  { %p1745_p13 = scmp.ne.s32.totalorder %s48_s18, %s1744_s21  ;;  %p1750_p1 = scmp.lt.s32.totalorder %s1744_s21, %s1744_s21 }
  0x40   :  { %p1751_p2 = por %p1750_p1, %p1749_p0 }
  0x42   :  { %p1752_p3 = pnand %p1751_p2, %p1745_p13 }
  0x44   :  { %1755 = shalt.err (!%p1752_p3)
}
  0x45   :  { %50 = dma.hbm_to_vmem [thread:$0]  %s2061_s2, 64, %s48_s18, [#allocation6]  }
  0x46   :  { %s1840_s22 = smov [#allocation10]   ;;  %s1841_s25 = smov [#allocation11]  }
  0x47   :  { %s70_s23 = sshll.u32 %s1840_s22, 4  ;;  %s84_s26 = sshll.u32 %s1841_s25, 4  ;;  %s71_s23 = int_to_ptr.vmem [resolvable:$true] %s70_s23  ;;  %s1950_s26 = int_to_ptr.vmem [resolvable:$true] %s84_s26 }
  0x48   :  { %s1756_s3 = scalar_lea.hbm %s2064_s5, 8192 }
  0x49   :  { %p1757_p4 = scmp.ne.s32.totalorder %s2064_s5, %s1756_s3  ;;  %p1760_p5 = scmp.lt.u32.totalorder %s1756_s3, %s2064_s5 }
  0x4b   :  { %p1762_p6 = pnand %p1760_p5, %p1757_p4 }
  0x4d   :  { %1765 = shalt.err (!%p1762_p6)
}
  0x4e   :  { %s1766_s2 = scalar_lea.vmem %s71_s23, 8192  ;;  %p1771_p8 = scmp.lt.s32.totalorder %s71_s23, %s71_s23 }
  0x4f   :  { %p1767_p7 = scmp.ne.s32.totalorder %s71_s23, %s1766_s2  ;;  %p1772_p9 = scmp.lt.s32.totalorder %s1766_s2, %s1766_s2 }
  0x51   :  { %p1773_p10 = por %p1772_p9, %p1771_p8 }
  0x53   :  { %p1774_p11 = pnand %p1773_p10, %p1767_p7 }
  0x55   :  { %1777 = shalt.err (!%p1774_p11)
}
  0x56   :  { %76 = dma.hbm_to_vmem [thread:$0]  %s2064_s5, 8192, %s71_s23, [#allocation9], %s1836_s1, %s1836_s1, %s1837_s10  }
  0x57   :  { %s1778_s15 = scalar_lea.hbm %s2066_s7, 2048 }
  0x58   :  { %p1779_p12 = scmp.ne.s32.totalorder %s2066_s7, %s1778_s15  ;;  %p1782_p13 = scmp.lt.u32.totalorder %s1778_s15, %s2066_s7 }
  0x5a   :  { %p1784_p0 = pnand %p1782_p13, %p1779_p12 }
  0x5c   :  { %1787 = shalt.err (!%p1784_p0)
}
  0x5d   :  { %s1788_s22 = scalar_lea.vmem %s1950_s26, 2048  ;;  %p1793_p2 = scmp.lt.s32.totalorder %s1950_s26, %s1950_s26 }
  0x5e   :  { %p1789_p1 = scmp.ne.s32.totalorder %s1950_s26, %s1788_s22  ;;  %p1794_p3 = scmp.lt.s32.totalorder %s1788_s22, %s1788_s22 }
  0x60   :  { %p1795_p4 = por %p1794_p3, %p1793_p2 }
  0x62   :  { %p1796_p5 = pnand %p1795_p4, %p1789_p1 }
  0x64   :  { %1799 = shalt.err (!%p1796_p5)
}
  0x65   :  { %90 = dma.hbm_to_vmem [thread:$0]  %s2066_s7, 2048, %s1950_s26, [#allocation12], %s1833_s19, %s1833_s19, %s1834_s20  }
  0x66   :  { %1822 = dma.done.wait [#allocation3], 128  }
  0x67   :  { %1823 = vsyncadd [#allocation3], 4294967168 }
  0x68   :  { %1824 = dma.done.wait [#allocation6], 576  }
  0x69   :  { %1825 = vsyncadd [#allocation6], 4294966720 }
  0x6a   :  { %1826 = dma.done.wait [#allocation9], 12288  }
  0x6b   :  { %1827 = vsyncadd [#allocation9], 4294955008 }
  0x6c   :  { %1828 = dma.done.wait [#allocation12], 2048  }
  0x6d   :  { %1829 = vsyncadd [#allocation12], 4294965248  ;;  %v1842_v0 = vmov 0.0   ;;  %vm1843_vm0 = vmmov 0   ;;  %v1498_v1 = vld [vmem:[#allocation5] sm:$0xff]   ;;  %v1499_v2 = vld [vmem:[#allocation5 + $0x8] sm:$0xff]   ;;  %v497_v61 = vlaneseq }
  0x6e   :  { %1472 = vmatprep.subr.bf16.mxu0 %v1842_v0  ;;  %1480 = vmatprep.mubr.msk.bf16.mxu0 %vm1843_vm0, %v1842_v0  ;;  %v1500_v3 = vld [vmem:[#allocation5 + $0x10] sm:$0xff]   ;;  %v1501_v4 = vld [vmem:[#allocation5 + $0x18] sm:$0xff]   ;;  %vm151_vm1 = vcmask 523264   ;;  %v1318_v7 = vld [vmem:[#allocation7] ss:$0 sm:$0xff]  ;;  %v1844_v43 = vmov 0  }
  0x6f   :  { %1473 = vmatpush3.bf16.msra.mxu0 %v1498_v1  ;;  %v112_v5 = vld [vmem:[#allocation2] sm:$0xff]  ;;  %v1506_v15 = vld [vmem:[#allocation8 + $0xc] ss:$16 sps:$4 sm:$0xff]   ;;  %v1507_v16 = vld [vmem:[#allocation8] ss:$16 sps:$4 sm:$0xff]   ;;  %445 = vmatprep.mubr.bf16.mxu1 %v1844_v43  ;;  %v498_v62 = vshrl.u32 %v497_v61, 7 }
  0x70   :  { %1474 = vmatprep.subr.bf16.mxu0 %v1842_v0  ;;  %v113_v6 = vpack.c.bf16 %v112_v5, %v112_v5  ;;  %v1502_v13 = vld [vmem:[#allocation8 + $0x4] ss:$16 sps:$4 sm:$0xff]   ;;  %v1504_v14 = vld [vmem:[#allocation8 + $0x8] ss:$16 sps:$4 sm:$0xff]   ;;  %v1512_v18 = vld [vmem:[#allocation8 + $0x2c] ss:$16 sps:$4 sm:$0xff]  }
  0x71   :  { %v1508_v17 = vld [vmem:[#allocation8 + $0x24] ss:$16 sps:$4 sm:$0xff]   ;;  %413 = vmatprep.subr.bf16.mxu1 %v1502_v13  ;;  %v1510_v19 = vld [vmem:[#allocation8 + $0x28] ss:$16 sps:$4 sm:$0xff]   ;;  %v1513_v20 = vld [vmem:[#allocation8 + $0x20] ss:$16 sps:$4 sm:$0xff]  }
  0x72   :  { %414 = vmatpush1.bf16.msra.mxu1 %v1507_v16  ;;  %v1514_v25 = vld [vmem:[#allocation8 + $0x44] ss:$16 sps:$4 sm:$0xff]   ;;  %v1518_v26 = vld [vmem:[#allocation8 + $0x4c] ss:$16 sps:$4 sm:$0xff]   ;;  %v1516_v27 = vld [vmem:[#allocation8 + $0x48] ss:$16 sps:$4 sm:$0xff]  }
  0x73   :  { %1475 = vmatpush3.bf16.msra.mxu0 %v1499_v2  ;;  %415 = vmatprep.subr.bf16.mxu1 %v1508_v17  ;;  %v1519_v28 = vld [vmem:[#allocation8 + $0x40] ss:$16 sps:$4 sm:$0xff]   ;;  %v1520_v29 = vld [vmem:[#allocation8 + $0x64] ss:$16 sps:$4 sm:$0xff]   ;;  %v1524_v30 = vld [vmem:[#allocation8 + $0x6c] ss:$16 sps:$4 sm:$0xff]  }
  0x74   :  { %1476 = vmatprep.subr.bf16.mxu0 %v1842_v0  ;;  %v1522_v31 = vld [vmem:[#allocation8 + $0x68] ss:$16 sps:$4 sm:$0xff]   ;;  %v1525_v32 = vld [vmem:[#allocation8 + $0x60] ss:$16 sps:$4 sm:$0xff]   ;;  %v1526_v33 = vld [vmem:[#allocation8 + $0x84] ss:$16 sps:$4 sm:$0xff]  }
  0x75   :  { %v1530_v34 = vld [vmem:[#allocation8 + $0x8c] ss:$16 sps:$4 sm:$0xff]   ;;  %v1528_v35 = vld [vmem:[#allocation8 + $0x88] ss:$16 sps:$4 sm:$0xff]   ;;  %v1531_v36 = vld [vmem:[#allocation8 + $0x80] ss:$16 sps:$4 sm:$0xff]  }
  0x76   :  { %416 = vmatpush1.bf16.msra.mxu1 %v1513_v20  ;;  %v1532_v37 = vld [vmem:[#allocation8 + $0xa4] ss:$16 sps:$4 sm:$0xff]   ;;  %v1536_v38 = vld [vmem:[#allocation8 + $0xac] ss:$16 sps:$4 sm:$0xff]   ;;  %v1534_v39 = vld [vmem:[#allocation8 + $0xa8] ss:$16 sps:$4 sm:$0xff]  }
  0x77   :  { %1477 = vmatpush3.bf16.msra.mxu0 %v1500_v3  ;;  %417 = vmatprep.subr.bf16.mxu1 %v1514_v25  ;;  %v1537_v40 = vld [vmem:[#allocation8 + $0xa0] ss:$16 sps:$4 sm:$0xff]   ;;  %v1538_v41 = vld [vmem:[#allocation8 + $0xc4] ss:$16 sps:$4 sm:$0xff]   ;;  %v1542_v42 = vld [vmem:[#allocation8 + $0xcc] ss:$16 sps:$4 sm:$0xff]  }
  0x78   :  { %1478 = vmatprep.subr.bf16.mxu0 %v1842_v0  ;;  %v1540_v44 = vld [vmem:[#allocation8 + $0xc8] ss:$16 sps:$4 sm:$0xff]   ;;  %v1543_v45 = vld [vmem:[#allocation8 + $0xc0] ss:$16 sps:$4 sm:$0xff]   ;;  %v1544_v46 = vld [vmem:[#allocation8 + $0xe4] ss:$16 sps:$4 sm:$0xff]  }
  0x79   :  { %v1548_v47 = vld [vmem:[#allocation8 + $0xec] ss:$16 sps:$4 sm:$0xff]   ;;  %v1546_v48 = vld [vmem:[#allocation8 + $0xe8] ss:$16 sps:$4 sm:$0xff]   ;;  %v1549_v49 = vld [vmem:[#allocation8 + $0xe0] ss:$16 sps:$4 sm:$0xff]  }
  0x7a   :  { %418 = vmatpush1.bf16.msra.mxu1 %v1519_v28  ;;  %v1324_v54 = vld [vmem:[#allocation7 + $0x1] ss:$0 sm:$0xff]  ;;  %v1325_v56 = vld [vmem:[#allocation7 + $0x2] ss:$0 sm:$0xff]  ;;  %v1990_v0 = vsub.s32 0, %v498_v62  ;;  %v1995_v2 = vsub.s32 1, %v498_v62 }
  0x7b   :  { %1479 = vmatpush3.bf16.msra.mxu0 %v1501_v4  ;;  %419 = vmatprep.subr.bf16.mxu1 %v1520_v29  ;;  %v495_v63 = vld [vmem:[%s2063_s4] ss:$4 sm:$0x3]  ;;  %v1358_v1 = vld [vmem:[%s2063_s4 + $0x1] ss:$4 sm:$0x3] }
  0x7c   :  { %454 = vmatprep.subr.bf16.mxu0 %v1506_v15  ;;  %v500_v3 = vrot.slane %v495_v63, %v1990_v0  ;;  %v515_v4 = vrot.slane %v1358_v1, %v1990_v0  ;;  %v504_v5 = vrot.slane %v495_v63, %v1995_v2  ;;  %v1555_v25 = vld [vmem:[#allocation10 + $0xc] ss:$16 sps:$4 sm:$0xff]   ;;  %v1556_v28 = vld [vmem:[#allocation10 + $0x20] ss:$16 sps:$4 sm:$0xff]   ;;  %v1559_v29 = vld [vmem:[#allocation10 + $0x28] ss:$16 sps:$4 sm:$0xff]  }
  0x7d   :  { %v1607_v61 = vld [vmem:[#allocation10 + $0x128] ss:$16 sps:$4 sm:$0xff]   ;;  %s1845_s12 = smov [#allocation13]  }
  0x7e   :  { %1481 = vmatmul.mubr.msk.bf16.vlgmr.msra.gmra.mrb[0].mxu0 %vm151_vm1, %v113_v6  ;;  %420 = vmatpush1.bf16.msra.mxu1 %v1525_v32  ;;  %v519_v6 = vrot.slane %v1358_v1, %v1995_v2  ;;  %v1562_v32 = vld [vmem:[#allocation10 + $0x40] ss:$16 sps:$4 sm:$0xff]   ;;  %s1306_s13 = sshll.u32 %s1845_s12, 4  ;;  %s1307_s13 = int_to_ptr.vmem [resolvable:$true] %s1306_s13 }
  0x7f   :  { %455 = vmatpush1.bf16.msra.mxu0 %v1504_v14  ;;  %421 = vmatprep.subr.bf16.mxu1 %v1526_v33  ;;  %v1565_v33 = vld [vmem:[#allocation10 + $0x48] ss:$16 sps:$4 sm:$0xff]   ;;  %s1800_s14 = scalar_lea.vmem %s1307_s13, 128  ;;  %p1805_p7 = scmp.lt.s32.totalorder %s1307_s13, %s1307_s13 }
  0x80   :  { %456 = vmatprep.subr.bf16.mxu0 %v1512_v18  ;;  %486 = vmatprep.mubr.bf16.mxu0 %v1844_v43  ;;  %v1585_v43 = vld [vmem:[#allocation10 + $0xac] ss:$16 sps:$4 sm:$0xff]   ;;  %p1801_p6 = scmp.ne.s32.totalorder %s1307_s13, %s1800_s14  ;;  %p1806_p8 = scmp.lt.s32.totalorder %s1800_s14, %s1800_s14 }
  0x82   :  { %422 = vmatpush1.bf16.msra.mxu1 %v1531_v36  ;;  %v1568_v36 = vld [vmem:[#allocation10 + $0x60] ss:$16 sps:$4 sm:$0xff]   ;;  %p1807_p9 = por %p1806_p8, %p1805_p7 }
  0x83   :  { %457 = vmatpush1.bf16.msra.mxu0 %v1510_v19  ;;  %423 = vmatprep.subr.bf16.mxu1 %v1532_v37  ;;  %v1571_v37 = vld [vmem:[#allocation10 + $0x68] ss:$16 sps:$4 sm:$0xff]  }
  0x84   :  { %458 = vmatprep.subr.bf16.mxu0 %v1518_v26  ;;  %v1558_v26 = vld [vmem:[#allocation10 + $0x24] ss:$16 sps:$4 sm:$0xff]   ;;  %p1808_p10 = pnand %p1807_p9, %p1801_p6 }
  0x86   :  { %424 = vmatpush1.bf16.msra.mxu1 %v1537_v40  ;;  %v1574_v40 = vld [vmem:[#allocation10 + $0x80] ss:$16 sps:$4 sm:$0xff]  }
  0x87   :  { %459 = vmatpush1.bf16.msra.mxu0 %v1516_v27  ;;  %425 = vmatprep.subr.bf16.mxu1 %v1538_v41  ;;  %v1561_v27 = vld [vmem:[#allocation10 + $0x2c] ss:$16 sps:$4 sm:$0xff]   ;;  %v1577_v41 = vld [vmem:[#allocation10 + $0x88] ss:$16 sps:$4 sm:$0xff]  }
  0x88   :  { %460 = vmatprep.subr.bf16.mxu0 %v1524_v30  ;;  %v1564_v30 = vld [vmem:[#allocation10 + $0x44] ss:$16 sps:$4 sm:$0xff]  }
  0x8a   :  { %426 = vmatpush1.bf16.msra.mxu1 %v1543_v45  ;;  %v1583_v45 = vld [vmem:[#allocation10 + $0xa8] ss:$16 sps:$4 sm:$0xff]  }
  0x8b   :  { %461 = vmatpush1.bf16.msra.mxu0 %v1522_v31  ;;  %427 = vmatprep.subr.bf16.mxu1 %v1544_v46  ;;  %v1567_v31 = vld [vmem:[#allocation10 + $0x4c] ss:$16 sps:$4 sm:$0xff]   ;;  %v1588_v46 = vld [vmem:[#allocation10 + $0xc4] ss:$16 sps:$4 sm:$0xff]  }
  0x8c   :  { %462 = vmatprep.subr.bf16.mxu0 %v1530_v34  ;;  %v1570_v34 = vld [vmem:[#allocation10 + $0x64] ss:$16 sps:$4 sm:$0xff]  }
  0x8e   :  { %428 = vmatpush1.bf16.msra.mxu1 %v1549_v49  ;;  %v1589_v49 = vld [vmem:[#allocation10 + $0xc8] ss:$16 sps:$4 sm:$0xff]  }
  0x8f   :  { %463 = vmatpush1.bf16.msra.mxu0 %v1528_v35  ;;  %v1573_v35 = vld [vmem:[#allocation10 + $0x6c] ss:$16 sps:$4 sm:$0xff]  }
  0x90   :  { %464 = vmatprep.subr.bf16.mxu0 %v1536_v38  ;;  %v1576_v38 = vld [vmem:[#allocation10 + $0x84] ss:$16 sps:$4 sm:$0xff]  }
  0x93   :  { %465 = vmatpush1.bf16.msra.mxu0 %v1534_v39  ;;  %v1579_v39 = vld [vmem:[#allocation10 + $0x8c] ss:$16 sps:$4 sm:$0xff]  }
  0x94   :  { %466 = vmatprep.subr.bf16.mxu0 %v1542_v42  ;;  %v1582_v42 = vld [vmem:[#allocation10 + $0xa4] ss:$16 sps:$4 sm:$0xff]  }
  0x97   :  { %467 = vmatpush1.bf16.msra.mxu0 %v1540_v44  ;;  %v1580_v44 = vld [vmem:[#allocation10 + $0xa0] ss:$16 sps:$4 sm:$0xff]  }
  0x98   :  { %468 = vmatprep.subr.bf16.mxu0 %v1548_v47  ;;  %v1591_v47 = vld [vmem:[#allocation10 + $0xcc] ss:$16 sps:$4 sm:$0xff]  }
  0x9b   :  { %469 = vmatpush1.bf16.msra.mxu0 %v1546_v48  ;;  %v1586_v48 = vld [vmem:[#allocation10 + $0xc0] ss:$16 sps:$4 sm:$0xff]  }
  0x9c   :  { %1002 = vmatprep.subr.bf16.mxu0 %v1555_v25  ;;  %v1634_v25 = vld [vmem:[#allocation10 + $0x1c0] ss:$16 sps:$4 sm:$0xff]  }
 0x151   :  { %v189_v8 = vpop.f32.mrb[0].mxu0 }
 0x152   :  { %v190_v9 = vadd.f32 %v1318_v7, %v189_v8  ;;  %v1482_v10 = vpop.f32.mrb[1].mxu0 }
 0x153   :  { %v192_v11 = vpop.f32.mrb[2].mxu0 }
 0x154   :  { %197 = vadd.xlane.f32.xlu0 %v190_v9  ;;  %v1483_v12 = vpop.f32.mrb[3].mxu0 }
 0x1e1   :  { %v198_v21 = vpop.xlane.xlu0 %197 }
 0x1e2   :  { %v200_v22 = vmul.f32 0.0078125, %v198_v21 }
 0x1e4   :  { %v201_v23 = vsub.f32 %v190_v9, %v200_v22  ;;  %v1550_v22 = vld [vmem:[#allocation10] ss:$16 sps:$4 sm:$0xff]  }
 0x1e6   :  { %v202_v24 = vmul.f32 %v201_v23, %v201_v23 }
 0x1e8   :  { %203 = vadd.xlane.f32.xlu0 %v202_v24  ;;  %v1553_v24 = vld [vmem:[#allocation10 + $0x8] ss:$16 sps:$4 sm:$0xff]  }
 0x275   :  { %v204_v50 = vpop.xlane.xlu0 %203 }
 0x276   :  { %v205_v51 = vmul.f32 0.0078125, %v204_v50  ;;  %v1594_v50 = vld [vmem:[#allocation10 + $0xe4] ss:$16 sps:$4 sm:$0xff]  }
 0x278   :  { %v206_v52 = vadd.f32 1e-05, %v205_v51  ;;  %v1597_v51 = vld [vmem:[#allocation10 + $0xec] ss:$16 sps:$4 sm:$0xff]  }
 0x27a   :  { %1662 = vrsqrt.f32 %v206_v52  ;;  %v1592_v52 = vld [vmem:[#allocation10 + $0xe0] ss:$16 sps:$4 sm:$0xff]  }
 0x284   :  { %v1663_v53 = vpop.eup %1662 }
 0x285   :  { %v208_v55 = vmul.f32 %v1663_v53, %v201_v23  ;;  %v1552_v23 = vld [vmem:[#allocation10 + $0x4] ss:$16 sps:$4 sm:$0xff]   ;;  %v1595_v53 = vld [vmem:[#allocation10 + $0xe8] ss:$16 sps:$4 sm:$0xff]  }
 0x286   :  { %961 = vmatprep.subr.bf16.mxu1 %v1552_v23  ;;  %v1636_v23 = vld [vmem:[#allocation10 + $0x1c4] ss:$16 sps:$4 sm:$0xff]  }
 0x287   :  { %v213_v57 = vmul.f32 %v1324_v54, %v208_v55  ;;  %v1600_v54 = vld [vmem:[#allocation10 + $0x104] ss:$16 sps:$4 sm:$0xff]   ;;  %v1603_v55 = vld [vmem:[#allocation10 + $0x10c] ss:$16 sps:$4 sm:$0xff]  }
 0x289   :  { %v218_v58 = vadd.f32 %v1325_v56, %v213_v57  ;;  %v1598_v56 = vld [vmem:[#allocation10 + $0x100] ss:$16 sps:$4 sm:$0xff]   ;;  %v1601_v57 = vld [vmem:[#allocation10 + $0x108] ss:$16 sps:$4 sm:$0xff]  }
 0x28b   :  { %v219_v59 = vmax.f32 %v218_v58, 0.0  ;;  %v1606_v58 = vld [vmem:[#allocation10 + $0x124] ss:$16 sps:$4 sm:$0xff]  }
 0x28d   :  { %v220_v60 = vpack.c.bf16 %v219_v59, %v219_v59  ;;  %v1609_v59 = vld [vmem:[#allocation10 + $0x12c] ss:$16 sps:$4 sm:$0xff]  }
 0x28f   :  { %446 = vmatmul.mubr.bf16.vlgmr.msra.gmra.mrb[0].mxu1 %v220_v60  ;;  %487 = vmatmul.mubr.bf16.vlgmr.msra.gmra.mrb[4].mxu0 %v220_v60  ;;  %v1604_v60 = vld [vmem:[#allocation10 + $0x120] ss:$16 sps:$4 sm:$0xff]  }
 0x290   :  { %962 = vmatpush1.bf16.msra.mxu1 %v1550_v22  ;;  %1003 = vmatpush1.bf16.msra.mxu0 %v1553_v24  ;;  %v1631_v22 = vld [vmem:[#allocation10 + $0x1a8] ss:$16 sps:$4 sm:$0xff]   ;;  %v1639_v24 = vld [vmem:[#allocation10 + $0x1cc] ss:$16 sps:$4 sm:$0xff]  }
 0x291   :  { %963 = vmatprep.subr.bf16.mxu1 %v1558_v26  ;;  %1004 = vmatprep.subr.bf16.mxu0 %v1561_v27  ;;  %v1637_v26 = vld [vmem:[#allocation10 + $0x1c8] ss:$16 sps:$4 sm:$0xff]   ;;  %v1642_v27 = vld [vmem:[#allocation10 + $0x1e4] ss:$16 sps:$4 sm:$0xff]  }
 0x294   :  { %964 = vmatpush1.bf16.msra.mxu1 %v1556_v28  ;;  %1005 = vmatpush1.bf16.msra.mxu0 %v1559_v29  ;;  %v1645_v28 = vld [vmem:[#allocation10 + $0x1ec] ss:$16 sps:$4 sm:$0xff]   ;;  %v1640_v29 = vld [vmem:[#allocation10 + $0x1e0] ss:$16 sps:$4 sm:$0xff]  }
 0x295   :  { %965 = vmatprep.subr.bf16.mxu1 %v1564_v30  ;;  %1006 = vmatprep.subr.bf16.mxu0 %v1567_v31  ;;  %v1643_v30 = vld [vmem:[#allocation10 + $0x1e8] ss:$16 sps:$4 sm:$0xff]  }
 0x298   :  { %966 = vmatpush1.bf16.msra.mxu1 %v1562_v32  ;;  %1007 = vmatpush1.bf16.msra.mxu0 %v1565_v33 }
 0x299   :  { %967 = vmatprep.subr.bf16.mxu1 %v1570_v34  ;;  %1008 = vmatprep.subr.bf16.mxu0 %v1573_v35  ;;  %v1359_v34 = vld [vmem:[%s2063_s4 + $0x2] ss:$4 sm:$0x3]  ;;  %v1360_v35 = vld [vmem:[%s2063_s4 + $0x3] ss:$4 sm:$0x3] }
 0x29c   :  { %968 = vmatpush1.bf16.msra.mxu1 %v1568_v36  ;;  %1009 = vmatpush1.bf16.msra.mxu0 %v1571_v37  ;;  %v551_v36 = vrot.slane %v1359_v34, %v1990_v0  ;;  %v555_v37 = vrot.slane %v1359_v34, %v1995_v2 }
 0x29d   :  { %969 = vmatprep.subr.bf16.mxu1 %v1576_v38  ;;  %1010 = vmatprep.subr.bf16.mxu0 %v1579_v39 }
 0x2a0   :  { %970 = vmatpush1.bf16.msra.mxu1 %v1574_v40  ;;  %1011 = vmatpush1.bf16.msra.mxu0 %v1577_v41  ;;  %v564_v40 = vrot.slane %v1360_v35, %v1990_v0  ;;  %v568_v41 = vrot.slane %v1360_v35, %v1995_v2 }
 0x2a1   :  { %971 = vmatprep.subr.bf16.mxu1 %v1582_v42  ;;  %1012 = vmatprep.subr.bf16.mxu0 %v1585_v43 }
 0x2a4   :  { %972 = vmatpush1.bf16.msra.mxu1 %v1580_v44  ;;  %1013 = vmatpush1.bf16.msra.mxu0 %v1583_v45 }
 0x2a5   :  { %973 = vmatprep.subr.bf16.mxu1 %v1588_v46  ;;  %1014 = vmatprep.subr.bf16.mxu0 %v1591_v47 }
 0x2a8   :  { %974 = vmatpush1.bf16.msra.mxu1 %v1586_v48  ;;  %1015 = vmatpush1.bf16.msra.mxu0 %v1589_v49 }
 0x2a9   :  { %975 = vmatprep.subr.bf16.mxu1 %v1594_v50  ;;  %1016 = vmatprep.subr.bf16.mxu0 %v1597_v51  ;;  %v1043_v51 = vld [vmem:[%s2065_s6] ss:$4 sm:$0x3] }
 0x2ac   :  { %976 = vmatpush1.bf16.msra.mxu1 %v1592_v52  ;;  %1017 = vmatpush1.bf16.msra.mxu0 %v1595_v53  ;;  %v1425_v52 = vld [vmem:[%s2065_s6 + $0x1] ss:$4 sm:$0x3]  ;;  %v1048_v53 = vrot.slane %v1043_v51, %v1990_v0 }
 0x2ad   :  { %977 = vmatprep.subr.bf16.mxu1 %v1600_v54  ;;  %1018 = vmatprep.subr.bf16.mxu0 %v1603_v55  ;;  %v1063_v54 = vrot.slane %v1425_v52, %v1990_v0  ;;  %v1052_v55 = vrot.slane %v1043_v51, %v1995_v2 }
 0x2b0   :  { %978 = vmatpush1.bf16.msra.mxu1 %v1598_v56  ;;  %1019 = vmatpush1.bf16.msra.mxu0 %v1601_v57  ;;  %v1067_v56 = vrot.slane %v1425_v52, %v1995_v2 }
 0x2b1   :  { %979 = vmatprep.subr.bf16.mxu1 %v1606_v58  ;;  %1020 = vmatprep.subr.bf16.mxu0 %v1609_v59 }
 0x2b4   :  { %980 = vmatpush1.bf16.msra.mxu1 %v1604_v60  ;;  %1021 = vmatpush1.bf16.msra.mxu0 %v1607_v61 }
 0x362   :  { %v447_v7 = vpop.f32.mrb[0].mxu1  ;;  %v488_v8 = vpop.f32.mrb[4].mxu0 }
 0x363   :  { %v507_v9 = vadd.f32 %v500_v3, %v447_v7  ;;  %v522_v10 = vadd.f32 %v515_v4, %v488_v8  ;;  %v449_v11 = vpop.f32.mrb[1].mxu1  ;;  %v490_v12 = vpop.f32.mrb[5].mxu0  ;;  %v1612_v7 = vld [vmem:[#allocation10 + $0x144] ss:$16 sps:$4 sm:$0xff]   ;;  %v1615_v8 = vld [vmem:[#allocation10 + $0x14c] ss:$16 sps:$4 sm:$0xff]  }
 0x364   :  { %v508_v13 = vadd.f32 %v504_v5, %v449_v11  ;;  %v523_v14 = vadd.f32 %v519_v6, %v490_v12  ;;  %v451_v15 = vpop.f32.mrb[2].mxu1  ;;  %v492_v16 = vpop.f32.mrb[6].mxu0  ;;  %981 = vmatprep.subr.bf16.mxu1 %v1612_v7  ;;  %1022 = vmatprep.subr.bf16.mxu0 %v1615_v8  ;;  %v1616_v11 = vld [vmem:[#allocation10 + $0x160] ss:$16 sps:$4 sm:$0xff]   ;;  %v1618_v12 = vld [vmem:[#allocation10 + $0x164] ss:$16 sps:$4 sm:$0xff]  }
 0x365   :  { %v452_v17 = vpop.f32.mrb[3].mxu1  ;;  %v493_v18 = vpop.f32.mrb[7].mxu0  ;;  %v2001_v19 = vmax.f32 %v507_v9, %v522_v10  ;;  %v1610_v9 = vld [vmem:[#allocation10 + $0x140] ss:$16 sps:$4 sm:$0xff]   ;;  %v1613_v10 = vld [vmem:[#allocation10 + $0x148] ss:$16 sps:$4 sm:$0xff]  }
 0x366   :  { %v2003_v20 = vmax.f32 %v508_v13, %v523_v14  ;;  %982 = vmatpush1.bf16.msra.mxu1 %v1610_v9  ;;  %1023 = vmatpush1.bf16.msra.mxu0 %v1613_v10  ;;  %v1619_v13 = vld [vmem:[#allocation10 + $0x168] ss:$16 sps:$4 sm:$0xff]   ;;  %v1621_v14 = vld [vmem:[#allocation10 + $0x16c] ss:$16 sps:$4 sm:$0xff]   ;;  %v1624_v15 = vld [vmem:[#allocation10 + $0x184] ss:$16 sps:$4 sm:$0xff]  }
 0x367   :  { %983 = vmatprep.subr.bf16.mxu1 %v1618_v12  ;;  %v1627_v16 = vld [vmem:[#allocation10 + $0x18c] ss:$16 sps:$4 sm:$0xff]   ;;  %1024 = vmatprep.subr.bf16.mxu0 %v1621_v14  ;;  %v1622_v17 = vld [vmem:[#allocation10 + $0x180] ss:$16 sps:$4 sm:$0xff]   ;;  %v1625_v18 = vld [vmem:[#allocation10 + $0x188] ss:$16 sps:$4 sm:$0xff]  }
 0x368   :  { %v530_v21 = vadd.f32 %v2003_v20, %v2001_v19  ;;  %v1646_v10 = vld [vmem:[#allocation11 + $0x40] sm:$0xff]   ;;  %v1648_v12 = vld [vmem:[#allocation11 + $0x48] sm:$0xff]  }
 0x36a   :  { %531 = vadd.xlane.f32.xlu1 %v530_v21  ;;  %984 = vmatpush1.bf16.msra.mxu1 %v1616_v11  ;;  %v1628_v21 = vld [vmem:[#allocation10 + $0x1a0] ss:$16 sps:$4 sm:$0xff]  }
 0x36b   :  { %1025 = vmatpush1.bf16.msra.mxu0 %v1619_v13  ;;  %985 = vmatprep.subr.bf16.mxu1 %v1624_v15  ;;  %v1647_v11 = vld [vmem:[#allocation11] sm:$0xff]   ;;  %v1649_v13 = vld [vmem:[#allocation11 + $0x8] sm:$0xff]  }
 0x36c   :  { %1026 = vmatprep.subr.bf16.mxu0 %v1627_v16 }
 0x36e   :  { %986 = vmatpush1.bf16.msra.mxu1 %v1622_v17 }
 0x36f   :  { %1027 = vmatpush1.bf16.msra.mxu0 %v1625_v18 }
 0x3f7   :  { %v532_v62 = vpop.xlane.xlu1 %531 }
 0x3f8   :  { %v534_v63 = vmul.f32 0.00390625, %v532_v62 }
 0x3fa   :  { %v2008_v1 = vsub.f32 %v2001_v19, %v534_v63  ;;  %v536_v3 = vsub.f32 %v2003_v20, %v534_v63  ;;  %v1630_v19 = vld [vmem:[#allocation10 + $0x1a4] ss:$16 sps:$4 sm:$0xff]   ;;  %v1633_v20 = vld [vmem:[#allocation10 + $0x1ac] ss:$16 sps:$4 sm:$0xff]  }
 0x3fb   :  { %987 = vmatprep.subr.bf16.mxu1 %v1630_v19  ;;  %1028 = vmatprep.subr.bf16.mxu0 %v1633_v20 }
 0x3fc   :  { %v537_v4 = vmul.f32 %v2008_v1, %v2008_v1  ;;  %v538_v5 = vmul.f32 %v536_v3, %v536_v3  ;;  %988 = vmatpush1.bf16.msra.mxu1 %v1628_v21  ;;  %1029 = vmatpush1.bf16.msra.mxu0 %v1631_v22  ;;  %v1650_v21 = vld [vmem:[#allocation11 + $0x50] sm:$0xff]  }
 0x3fd   :  { %989 = vmatprep.subr.bf16.mxu1 %v1636_v23  ;;  %1030 = vmatprep.subr.bf16.mxu0 %v1639_v24  ;;  %v1651_v22 = vld [vmem:[#allocation11 + $0x10] sm:$0xff]   ;;  %v1652_v23 = vld [vmem:[#allocation11 + $0x58] sm:$0xff]  }
 0x3fe   :  { %v539_v6 = vadd.f32 %v538_v5, %v537_v4  ;;  %v1653_v24 = vld [vmem:[#allocation11 + $0x18] sm:$0xff]  }
 0x400   :  { %540 = vadd.xlane.f32.xlu1 %v539_v6  ;;  %990 = vmatpush1.bf16.msra.mxu1 %v1634_v25  ;;  %v1654_v25 = vld [vmem:[#allocation11 + $0x60] sm:$0xff]  }
 0x401   :  { %1031 = vmatpush1.bf16.msra.mxu0 %v1637_v26  ;;  %991 = vmatprep.subr.bf16.mxu1 %v1642_v27  ;;  %v1655_v26 = vld [vmem:[#allocation11 + $0x20] sm:$0xff]   ;;  %v1656_v27 = vld [vmem:[#allocation11 + $0x68] sm:$0xff]  }
 0x402   :  { %1032 = vmatprep.subr.bf16.mxu0 %v1645_v28  ;;  %v1657_v28 = vld [vmem:[#allocation11 + $0x28] sm:$0xff]  }
 0x404   :  { %992 = vmatpush1.bf16.msra.mxu1 %v1640_v29  ;;  %v1658_v29 = vld [vmem:[#allocation11 + $0x70] sm:$0xff]  }
 0x405   :  { %1033 = vmatpush1.bf16.msra.mxu0 %v1643_v30  ;;  %1450 = vmatprep.subr.bf16.mxu1 %v1646_v10  ;;  %v1659_v30 = vld [vmem:[#allocation11 + $0x30] sm:$0xff]  }
 0x48d   :  { %v541_v31 = vpop.xlane.xlu1 %540 }
 0x48e   :  { %v542_v32 = vmul.f32 0.00390625, %v541_v31  ;;  %v1660_v31 = vld [vmem:[#allocation11 + $0x78] sm:$0xff]  }
 0x490   :  { %v543_v33 = vadd.f32 1e-05, %v542_v32  ;;  %v1661_v32 = vld [vmem:[#allocation11 + $0x38] sm:$0xff]  }
 0x492   :  { %1664 = vrsqrt.f32 %v543_v33 }
 0x49c   :  { %v1665_v38 = vpop.eup %1664 }
 0x49d   :  { %v546_v39 = vmul.f32 %v1665_v38, %v536_v3  ;;  %v545_v42 = vmul.f32 %v1665_v38, %v2008_v1 }
 0x49f   :  { %v559_v43 = vmul.f32 %v555_v37, %v546_v39  ;;  %v558_v44 = vmul.f32 %v551_v36, %v545_v42  ;;  %v1426_v36 = vld [vmem:[%s2065_s6 + $0x2] ss:$4 sm:$0x3]  ;;  %v1427_v37 = vld [vmem:[%s2065_s6 + $0x3] ss:$4 sm:$0x3] }
 0x4a0   :  { %v1098_v38 = vrot.slane %v1426_v36, %v1990_v0  ;;  %v1102_v39 = vrot.slane %v1426_v36, %v1995_v2 }
 0x4a1   :  { %v572_v45 = vadd.f32 %v568_v41, %v559_v43  ;;  %v571_v46 = vadd.f32 %v564_v40, %v558_v44  ;;  %v1111_v43 = vrot.slane %v1427_v37, %v1990_v0  ;;  %v1115_v44 = vrot.slane %v1427_v37, %v1995_v2 }
 0x4a3   :  { %v574_v47 = vmax.f32 %v572_v45, 0.0  ;;  %v573_v48 = vmax.f32 %v571_v46, 0.0 }
 0x4a5   :  { %v576_v49 = vpack.c.bf16 %v574_v47, %v574_v47  ;;  %v575_v50 = vpack.c.bf16 %v573_v48, %v573_v48 }
 0x4a7   :  { %993 = vmatprep.mubr.bf16.mxu1 %v576_v49  ;;  %1034 = vmatprep.mubr.bf16.mxu0 %v576_v49 }
 0x4a8   :  { %994 = vmatmul.mubr.bf16.vlgmr.msra.gmra.mrb[4].mxu1 %v575_v50  ;;  %1035 = vmatmul.mubr.bf16.vlgmr.msra.gmra.mrb[8].mxu0 %v575_v50 }
 0x4a9   :  { %1451 = vmatpush3.bf16.msra.mxu1 %v1647_v11 }
 0x4aa   :  { %1452 = vmatprep.subr.bf16.mxu1 %v1648_v12 }
 0x4ad   :  { %1453 = vmatpush3.bf16.msra.mxu1 %v1649_v13 }
 0x4ae   :  { %1454 = vmatprep.subr.bf16.mxu1 %v1650_v21 }
 0x4b1   :  { %1455 = vmatpush3.bf16.msra.mxu1 %v1651_v22 }
 0x4b2   :  { %1456 = vmatprep.subr.bf16.mxu1 %v1652_v23 }
 0x4b5   :  { %1457 = vmatpush3.bf16.msra.mxu1 %v1653_v24 }
 0x4b6   :  { %1458 = vmatprep.subr.bf16.mxu1 %v1654_v25 }
 0x4b9   :  { %1459 = vmatpush3.bf16.msra.mxu1 %v1655_v26 }
 0x4ba   :  { %1460 = vmatprep.subr.bf16.mxu1 %v1656_v27 }
 0x4bd   :  { %1461 = vmatpush3.bf16.msra.mxu1 %v1657_v28 }
 0x4be   :  { %1462 = vmatprep.subr.bf16.mxu1 %v1658_v29 }
 0x4c1   :  { %1463 = vmatpush3.bf16.msra.mxu1 %v1659_v30 }
 0x4c2   :  { %1464 = vmatprep.subr.bf16.mxu1 %v1660_v31 }
 0x4c5   :  { %1465 = vmatpush3.bf16.msra.mxu1 %v1661_v32 }
 0x57b   :  { %v995_v57 = vpop.f32.mrb[4].mxu1  ;;  %v1036_v58 = vpop.f32.mrb[8].mxu0 }
 0x57c   :  { %v1055_v59 = vadd.f32 %v1048_v53, %v995_v57  ;;  %v1070_v60 = vadd.f32 %v1063_v54, %v1036_v58  ;;  %v997_v61 = vpop.f32.mrb[5].mxu1  ;;  %v1038_v62 = vpop.f32.mrb[9].mxu0  ;;  %v1428_v54 = vld [vmem:[%s2067_s8] ss:$0 sm:$0xff] }
 0x57d   :  { %v1056_v63 = vadd.f32 %v1052_v55, %v997_v61  ;;  %v1071_v1 = vadd.f32 %v1067_v56, %v1038_v62  ;;  %v999_v3 = vpop.f32.mrb[6].mxu1  ;;  %v1040_v4 = vpop.f32.mrb[10].mxu0 }
 0x57e   :  { %v1072_v5 = vmax.f32 %v1055_v59, %v1070_v60  ;;  %v1000_v6 = vpop.f32.mrb[7].mxu1  ;;  %v1041_v7 = vpop.f32.mrb[11].mxu0 }
 0x57f   :  { %v1073_v8 = vmax.f32 %v1056_v63, %v1071_v1 }
 0x581   :  { %v1078_v9 = vadd.f32 %v1073_v8, %v1072_v5 }
 0x583   :  { %1079 = vadd.xlane.f32.xlu0 %v1078_v9 }
 0x610   :  { %v1080_v14 = vpop.xlane.xlu0 %1079 }
 0x611   :  { %v1081_v15 = vmul.f32 0.00390625, %v1080_v14 }
 0x613   :  { %v1082_v16 = vsub.f32 %v1072_v5, %v1081_v15  ;;  %v1083_v17 = vsub.f32 %v1073_v8, %v1081_v15 }
 0x615   :  { %v1084_v18 = vmul.f32 %v1082_v16, %v1082_v16  ;;  %v1085_v19 = vmul.f32 %v1083_v17, %v1083_v17 }
 0x617   :  { %v1086_v20 = vadd.f32 %v1085_v19, %v1084_v18 }
 0x619   :  { %1087 = vadd.xlane.f32.xlu1 %v1086_v20 }
 0x6a6   :  { %v1088_v33 = vpop.xlane.xlu1 %1087 }
 0x6a7   :  { %v1089_v34 = vmul.f32 0.00390625, %v1088_v33 }
 0x6a9   :  { %v1090_v35 = vadd.f32 1e-05, %v1089_v34 }
 0x6ab   :  { %1666 = vrsqrt.f32 %v1090_v35 }
 0x6b5   :  { %v1667_v40 = vpop.eup %1666 }
 0x6b6   :  { %v1092_v41 = vmul.f32 %v1667_v40, %v1082_v16  ;;  %v1093_v42 = vmul.f32 %v1667_v40, %v1083_v17 }
 0x6b8   :  { %v1106_v45 = vmul.f32 %v1102_v39, %v1093_v42  ;;  %v1105_v46 = vmul.f32 %v1098_v38, %v1092_v41 }
 0x6ba   :  { %v1119_v47 = vadd.f32 %v1115_v44, %v1106_v45  ;;  %v1118_v48 = vadd.f32 %v1111_v43, %v1105_v46 }
 0x6bc   :  { %v1121_v49 = vmax.f32 %v1119_v47, 0.0  ;;  %v1120_v50 = vmax.f32 %v1118_v48, 0.0 }
 0x6be   :  { %v1123_v51 = vpack.c.bf16 %v1121_v49, %v1121_v49  ;;  %v1122_v52 = vpack.c.bf16 %v1120_v50, %v1120_v50 }
 0x6c0   :  { %1291 = vmatprep.mubr.bf16.mxu1 %v1123_v51 }
 0x6c1   :  { %1292 = vmatmul.mubr.bf16.vlgmr.msra.gmra.mrb[8].mxu1 %v1122_v52 }
 0x794   :  { %v1466_v53 = vpop.f32.mrb[8].mxu1 }
 0x795   :  { %v1467_v55 = vpop.f32.mrb[9].mxu1 }
 0x796   :  { %v1468_v0 = vadd.f32 %v1467_v55, %v1466_v53  ;;  %v1469_v2 = vpop.f32.mrb[10].mxu1 }
 0x797   :  { %v1470_v56 = vpop.f32.mrb[11].mxu1 }
 0x798   :  { %v1294_v57 = vadd.f32 %v1468_v0, %v1428_v54 }
 0x79a   :  { %1299 = vst [vmem:[#allocation13] sm:$0xff] %v1294_v57 }
 0x79b   :  { %1811 = shalt.err (!%p1808_p10)
}
 0x79c   :  { %s1812_s8 = scalar_lea.hbm %s2068_s9, 128 }
 0x79d   :  { %p1813_p11 = scmp.ne.s32.totalorder %s2068_s9, %s1812_s8  ;;  %p1816_p12 = scmp.lt.u32.totalorder %s1812_s8, %s2068_s9 }
 0x79f   :  { %p1818_p13 = pnand %p1816_p12, %p1813_p11 }
 0x7a1   :  { %1821 = shalt.err (!%p1818_p13)
}
 0x7a2   :  { %1309 = dma.vmem_to_hbm [thread:$0]  %s1307_s13, 128, %s2068_s9, [#allocation4]  }
 0x7a3   :  { %1830 = dma.done.wait [#allocation4], 128  }
 0x7a4   :  { %1831 = vsyncadd [#allocation4], 4294967168 }
 0x7a5   :  { %1313 = vsyncpa [#allocation3], 1 }
 0x7a6   :  { %1314 = vsyncpa [#allocation6], 1 }
 0x7a7   :  { %1315 = vsyncpa [#allocation9], 1 }
 0x7a8   :  { %1316 = vsyncpa [#allocation12], 1 }
 0x7a9   :  { %1317 = vsyncpa [#allocation4], 1 }

</bundles_post_ra>
